<compile_context>
chip_gen: v6e
topology: v6e:2x2x1
jax: 0.10.0
libtpu: 0.0.40
codegen_flags: <defaults>
</compile_context>

<pallas_src>
import jax
import jax.numpy as jnp
from jax.experimental import pallas as pl
from jax.experimental.pallas import tpu as pltpu


def shared_model_kernel(x_ref, w_ref, b_ref, out_ref):
    """Fused top|bottom linear + concat, one tile.

    x_ref  : [bm, D]   f32 input tile (cast to bf16 in-kernel for the MXU)
    w_ref  : [D,  tn]  bf16 fused weight slab (top cols | bottom cols)
    b_ref  : [1,  tn]  f32 fused bias
    out_ref: [bm, tn]  f32/bf16 output tile — lane-dense store when tn % 128 == 0
    """
    x = x_ref[...].astype(w_ref.dtype)                       # in-kernel f32->bf16
    acc = jnp.dot(x, w_ref[...], preferred_element_type=jnp.float32)
    out_ref[...] = (acc + b_ref[...]).astype(out_ref.dtype)  # f32 bias epilogue


def fuse_shared_params(w_top, b_top, w_bot, b_bot, *, compute_dtype=jnp.bfloat16):
    """One-time parameter fusion (hoisted out of the per-call path).

    Column layout [0,H1)=top, [H1,H1+H2)=bottom reproduces
    torch.cat((top(x), bottom(x)), dim=1) exactly.  Weights are stored [D, H]
    (transposed from PyTorch's [H, D]); biases may be (H,) or (1, H).
    """
    w = jnp.concatenate([w_top, w_bot], axis=1).astype(compute_dtype)
    b = jnp.concatenate([jnp.reshape(b_top, (1, -1)),
                         jnp.reshape(b_bot, (1, -1))], axis=1).astype(jnp.float32)
    return w, b


def _round_up(v, m):
    return ((v + m - 1) // m) * m


def _build_call(B, D, H, bm, tn, x_dtype, w_dtype, out_dtype, single_buffer_params):
    grid_m = pl.cdiv(B, bm)
    grid_n = pl.cdiv(H, tn)

    # Weight/bias are resident (constant index_map) only when there is no
    # feature-axis tiling; single-buffer them then to reclaim VMEM.
    if single_buffer_params and grid_n == 1:
        w_spec = pl.BlockSpec((D, tn), lambda i, j: (0, j),
                              pipeline_mode=pl.Buffered(1))
        b_spec = pl.BlockSpec((1, tn), lambda i, j: (0, j),
                              pipeline_mode=pl.Buffered(1))
        w_bufs = 1
    else:
        w_spec = pl.BlockSpec((D, tn), lambda i, j: (0, j))
        b_spec = pl.BlockSpec((1, tn), lambda i, j: (0, j))
        w_bufs = 2

    x_isz = jnp.dtype(x_dtype).itemsize
    w_isz = jnp.dtype(w_dtype).itemsize
    o_isz = jnp.dtype(out_dtype).itemsize

    # VMEM budget: double-buffered x/out + weight/bias; clamp to a window that
    # is safe on v5e/v6e (128 MiB physical) AND v7x (64 MiB physical).
    need = (2 * bm * D * x_isz
            + w_bufs * D * tn * w_isz
            + 2 * tn * 4
            + 2 * bm * tn * o_isz)
    vmem_limit = int(min(max(32 * 1024 * 1024, 2 * need), 48 * 1024 * 1024))

    cost = pl.CostEstimate(
        flops=2 * B * D * H + B * H,
        transcendentals=0,
        bytes_accessed=(B * D * x_isz + D * H * w_isz + H * 4 + B * H * o_isz),
    )

    return pl.pallas_call(
        shared_model_kernel,
        out_shape=jax.ShapeDtypeStruct((B, H), out_dtype),
        grid=(grid_m, grid_n),
        in_specs=[
            pl.BlockSpec((bm, D), lambda i, j: (i, 0)),   # x: tiled over batch
            w_spec,                                       # fused weight
            b_spec,                                       # fused bias
        ],
        out_specs=pl.BlockSpec((bm, tn), lambda i, j: (i, j)),  # lane-dense out
        compiler_params=pltpu.CompilerParams(
            dimension_semantics=("parallel", "parallel"),
            vmem_limit_bytes=vmem_limit,
        ),
        cost_estimate=cost,
    )


def shared_model(x, w_fused, b_fused, *, block_m=512, block_n=512,
                 out_dtype=jnp.float32):
    """Equivalent of torch.cat((top_linear(x), bottom_linear(x)), dim=1)."""
    B, D = x.shape
    H = w_fused.shape[1]

    # Batch tile: large to amortize ~0.35 us per grid step; when B > 8 keep at
    # least 2 grid steps so the "parallel" axis shards across v7x's 2 TCs.
    if B <= 8:
        bm = B
    else:
        bm = min(block_m, B)
        if pl.cdiv(B, bm) < 2:
            bm = min(bm, _round_up(pl.cdiv(B, 2), 8))
    # NOTE: if B % bm != 0 the last grid step reads a padded partial x block
    # (Pallas masks it); results stay correct.

    # Feature-axis tiling only when the fused output is wide: bounds weight and
    # out-tile VMEM growth (v7x: 64 MiB) while keeping stores 128-lane dense.
    if H % 128 == 0 and H > block_n:
        tn = block_n
    else:
        tn = H

    try:
        call = _build_call(B, D, H, bm, tn, x.dtype, w_fused.dtype, out_dtype,
                           single_buffer_params=True)
        return jax.block_until_ready(call(x, w_fused, b_fused))
    except Exception:
        # Fallback if this JAX build rejects pl.Buffered(1) on resident blocks.
        call = _build_call(B, D, H, bm, tn, x.dtype, w_fused.dtype, out_dtype,
                           single_buffer_params=False)
        return jax.block_until_ready(call(x, w_fused, b_fused))


if __name__ == "__main__":
    # Small shapes: batch=8, in-features=32, each submodel outputs 64 features
    # (fused output width = 128 = one full lane group).
    B, D, H1, H2 = 8, 32, 64, 64

    key = jax.random.PRNGKey(0)
    kx, kwt, kbt, kwb, kbb = jax.random.split(key, 5)

    x = jax.random.normal(kx, (B, D), dtype=jnp.float32)
    # nn.Linear-style params, stored as [D, H] (transposed) with (H,) biases.
    w_top = jax.random.normal(kwt, (D, H1), dtype=jnp.float32) * 0.05
    b_top = jax.random.normal(kbt, (H1,), dtype=jnp.float32) * 0.05
    w_bot = jax.random.normal(kwb, (D, H2), dtype=jnp.float32) * 0.05
    b_bot = jax.random.normal(kbb, (H2,), dtype=jnp.float32) * 0.05

    # One-time, hoisted parameter fusion (not on the per-call path).
    w_fused, b_fused = fuse_shared_params(w_top, b_top, w_bot, b_bot)

    out = shared_model(x, w_fused, b_fused)
    out = jax.block_until_ready(out)

    # Reference: torch.cat((x @ Wt + bt, x @ Wb + bb), dim=1) with the same
    # bf16-input / f32-accumulate recipe the MXU uses.
    xr = x.astype(jnp.bfloat16).astype(jnp.float32)
    wtr = w_top.astype(jnp.bfloat16).astype(jnp.float32)
    wbr = w_bot.astype(jnp.bfloat16).astype(jnp.float32)
    ref = jnp.concatenate([xr @ wtr + b_top[None, :],
                           xr @ wbr + b_bot[None, :]], axis=1)

    assert out.shape == (B, H1 + H2)
    assert jnp.allclose(out, ref, atol=1e-3, rtol=1e-3), (
        float(jnp.max(jnp.abs(out - ref))))

    print("KERNEL_OK")
</pallas_src>

<mosaic_0001>
module attributes {stable_mosaic.version = 11 : i64} {
  func.func @shared_model_kernel(%arg0: i32, %arg1: i32, %arg2: memref<8x32xf32, #tpu.memory_space<vmem>>, %arg3: memref<32x128xbf16, #tpu.memory_space<vmem>>, %arg4: memref<1x128xf32, #tpu.memory_space<vmem>>, %arg5: memref<8x128xf32, #tpu.memory_space<vmem>>) attributes {dimension_semantics = [#tpu.dimension_semantics<parallel>, #tpu.dimension_semantics<parallel>], iteration_bounds = array<i64: 1, 1>, scalar_prefetch = 0 : i64, scratch_operands = 0 : i64, tpu.core_type = #tpu.core_type<tc>, window_params = [{transform_indices = @transform_0, window_bounds = array<i64: 8, 32>}, {pipeline_mode = #tpu.pipeline_mode<synchronous>, transform_indices = @transform_1, window_bounds = array<i64: 32, 128>}, {pipeline_mode = #tpu.pipeline_mode<synchronous>, transform_indices = @transform_2, window_bounds = array<i64: 1, 128>}, {transform_indices = @transform_3, window_bounds = array<i64: 8, 128>}]} {
    %c0 = arith.constant 0 : index
    %c0_0 = arith.constant 0 : index
    %0 = vector.load %arg2[%c0, %c0_0] : memref<8x32xf32, #tpu.memory_space<vmem>>, vector<8x32xf32>
    %1 = arith.truncf %0 : vector<8x32xf32> to vector<8x32xbf16>
    %c0_1 = arith.constant 0 : index
    %c0_2 = arith.constant 0 : index
    %2 = vector.load %arg3[%c0_1, %c0_2] : memref<32x128xbf16, #tpu.memory_space<vmem>>, vector<32x128xbf16>
    %cst = arith.constant dense<0.000000e+00> : vector<8x128xf32>
    %3 = tpu.matmul %1, %2, %cst {dimension_numbers = #tpu.dot_dimension_numbers<[1], [0], [0], [1], [0, 0, 1, 1], [], []>} : vector<8x32xbf16>, vector<32x128xbf16>, vector<8x128xf32> -> vector<8x128xf32>
    %c0_3 = arith.constant 0 : index
    %c0_4 = arith.constant 0 : index
    %4 = vector.load %arg4[%c0_3, %c0_4] : memref<1x128xf32, #tpu.memory_space<vmem>>, vector<1x128xf32>
    %5 = vector.broadcast %4 : vector<1x128xf32> to vector<8x128xf32>
    %6 = arith.addf %3, %5 : vector<8x128xf32>
    %c0_5 = arith.constant 0 : index
    %c0_6 = arith.constant 0 : index
    %7 = vector.load %arg5[%c0_5, %c0_6] : memref<8x128xf32, #tpu.memory_space<vmem>>, vector<8x128xf32>
    tpu.vector_store %arg5[%c0_5, %c0_6], %6 {strides = array<i32>} : memref<8x128xf32, #tpu.memory_space<vmem>>, vector<8x128xf32>,
    return
  }
  func.func @transform_0(%arg0: i32, %arg1: i32) -> (i32, i32) {
    %c0_i32 = arith.constant 0 : i32
    %c0_i32_0 = arith.constant 0 : i32
    return %arg0, %c0_i32 : i32, i32
  }
  func.func @transform_1(%arg0: i32, %arg1: i32) -> (i32, i32) {
    %c0_i32 = arith.constant 0 : i32
    %c0_i32_0 = arith.constant 0 : i32
    return %c0_i32, %arg1 : i32, i32
  }
  func.func @transform_2(%arg0: i32, %arg1: i32) -> (i32, i32) {
    %c0_i32 = arith.constant 0 : i32
    %c0_i32_0 = arith.constant 0 : i32
    return %c0_i32, %arg1 : i32, i32
  }
  func.func @transform_3(%arg0: i32, %arg1: i32) -> (i32, i32) {
    %c0_i32 = arith.constant 0 : i32
    return %arg0, %arg1 : i32, i32
  }
}

module attributes {stable_mosaic.version = 11 : i64} {
  func.func @shared_model_kernel(%arg0: i32, %arg1: i32, %arg2: memref<8x32xf32, #tpu.memory_space<vmem>>, %arg3: memref<32x128xbf16, #tpu.memory_space<vmem>>, %arg4: memref<1x128xf32, #tpu.memory_space<vmem>>, %arg5: memref<8x128xf32, #tpu.memory_space<vmem>>) attributes {dimension_semantics = [#tpu.dimension_semantics<parallel>, #tpu.dimension_semantics<parallel>], iteration_bounds = array<i64: 1, 1>, scalar_prefetch = 0 : i64, scratch_operands = 0 : i64, tpu.core_type = #tpu.core_type<tc>, window_params = [{transform_indices = @transform_0, window_bounds = array<i64: 8, 32>}, {transform_indices = @transform_1, window_bounds = array<i64: 32, 128>}, {transform_indices = @transform_2, window_bounds = array<i64: 1, 128>}, {transform_indices = @transform_3, window_bounds = array<i64: 8, 128>}]} {
    %c0 = arith.constant 0 : index
    %c0_0 = arith.constant 0 : index
    %0 = vector.load %arg2[%c0, %c0_0] : memref<8x32xf32, #tpu.memory_space<vmem>>, vector<8x32xf32>
    %1 = arith.truncf %0 : vector<8x32xf32> to vector<8x32xbf16>
    %c0_1 = arith.constant 0 : index
    %c0_2 = arith.constant 0 : index
    %2 = vector.load %arg3[%c0_1, %c0_2] : memref<32x128xbf16, #tpu.memory_space<vmem>>, vector<32x128xbf16>
    %cst = arith.constant dense<0.000000e+00> : vector<8x128xf32>
    %3 = tpu.matmul %1, %2, %cst {dimension_numbers = #tpu.dot_dimension_numbers<[1], [0], [0], [1], [0, 0, 1, 1], [], []>} : vector<8x32xbf16>, vector<32x128xbf16>, vector<8x128xf32> -> vector<8x128xf32>
    %c0_3 = arith.constant 0 : index
    %c0_4 = arith.constant 0 : index
    %4 = vector.load %arg4[%c0_3, %c0_4] : memref<1x128xf32, #tpu.memory_space<vmem>>, vector<1x128xf32>
    %5 = vector.broadcast %4 : vector<1x128xf32> to vector<8x128xf32>
    %6 = arith.addf %3, %5 : vector<8x128xf32>
    %c0_5 = arith.constant 0 : index
    %c0_6 = arith.constant 0 : index
    %7 = vector.load %arg5[%c0_5, %c0_6] : memref<8x128xf32, #tpu.memory_space<vmem>>, vector<8x128xf32>
    tpu.vector_store %arg5[%c0_5, %c0_6], %6 {strides = array<i32>} : memref<8x128xf32, #tpu.memory_space<vmem>>, vector<8x128xf32>,
    return
  }
  func.func @transform_0(%arg0: i32, %arg1: i32) -> (i32, i32) {
    %c0_i32 = arith.constant 0 : i32
    %c0_i32_0 = arith.constant 0 : i32
    return %arg0, %c0_i32 : i32, i32
  }
  func.func @transform_1(%arg0: i32, %arg1: i32) -> (i32, i32) {
    %c0_i32 = arith.constant 0 : i32
    %c0_i32_0 = arith.constant 0 : i32
    return %c0_i32, %arg1 : i32, i32
  }
  func.func @transform_2(%arg0: i32, %arg1: i32) -> (i32, i32) {
    %c0_i32 = arith.constant 0 : i32
    %c0_i32_0 = arith.constant 0 : i32
    return %c0_i32, %arg1 : i32, i32
  }
  func.func @transform_3(%arg0: i32, %arg1: i32) -> (i32, i32) {
    %c0_i32 = arith.constant 0 : i32
    return %arg0, %arg1 : i32, i32
  }
}

</mosaic_0001>

<bundles_post_ra>
// kernel: tpu_custom_call.1
= control target key start
LH: loop header
LB: loop body
LE: loop exit
PB: predicated region body
PF: predicated region fallthrough
CT: control target
= control target key end

     0   :  { %8 = vsyncpa [#allocation3], 0  ;;  %s257_s0 = inlined_call_operand.hbm [shape: f32[8,32], index: 0, kind: input, shape index: {}]   ;;  %s258_s1 = inlined_call_operand.hbm [shape: bf16[32,128], index: 1, kind: input, shape index: {}]   ;;  %s259_s2 = inlined_call_operand.vmem [shape: f32[1,128], index: 2, kind: input, shape index: {}]   ;;  %s260_s3 = inlined_call_operand.hbm [shape: f32[8,128], index: 3, kind: output, shape index: {}]  }
   0x1   :  { %9 = vsyncpa [#allocation6], 0 }
   0x2   :  { %10 = vsyncpa [#allocation4], 0  ;;  %s218_s12 = smov [#allocation2]   ;;  %s219_s14 = smov [#allocation5]  }
   0x3   :  { %s17_s13 = sshll.u32 %s218_s12, 4  ;;  %s26_s15 = sshll.u32 %s219_s14, 4  ;;  %s18_s13 = int_to_ptr.vmem [resolvable:$true] %s17_s13  ;;  %s27_s15 = int_to_ptr.vmem [resolvable:$true] %s26_s15 }
   0x4   :  { %s160_s16 = scalar_lea.vmem %s18_s13, 128  ;;  %p165_p1 = scmp.lt.s32.totalorder %s18_s13, %s18_s13 }
   0x5   :  { %p161_p0 = scmp.ne.s32.totalorder %s18_s13, %s160_s16  ;;  %p166_p2 = scmp.lt.s32.totalorder %s160_s16, %s160_s16 }
   0x7   :  { %p167_p3 = por %p166_p2, %p165_p1 }
   0x9   :  { %p168_p4 = pnand %p167_p3, %p161_p0 }
   0xb   :  { %171 = shalt.err (!%p168_p4)
}
   0xc   :  { %20 = dma.hbm_to_vmem [thread:$0]  %s257_s0, 128, %s18_s13, [#allocation3]  }
   0xd   :  { %s180_s19 = scalar_lea.vmem %s27_s15, 256  ;;  %p185_p6 = scmp.lt.s32.totalorder %s27_s15, %s27_s15 }
   0xe   :  { %p181_p5 = scmp.ne.s32.totalorder %s27_s15, %s180_s19  ;;  %p186_p7 = scmp.lt.s32.totalorder %s180_s19, %s180_s19 }
  0x10   :  { %p187_p8 = por %p186_p7, %p185_p6 }
  0x12   :  { %p188_p9 = pnand %p187_p8, %p181_p5 }
  0x14   :  { %191 = shalt.err (!%p188_p9)
}
  0x15   :  { %s220_s20 = smov 64   ;;  %s221_s21 = smov 4  }
  0x16   :  { %32 = dma.hbm_to_vmem [thread:$0]  %s258_s1, 256, %s27_s15, [#allocation6], %s220_s20, %s220_s20, %s221_s21  }
  0x17   :  { %212 = dma.done.wait [#allocation3], 128  }
  0x18   :  { %213 = vsyncadd [#allocation3], 4294967168 }
  0x19   :  { %214 = dma.done.wait [#allocation6], 256  }
  0x1a   :  { %215 = vsyncadd [#allocation6], 4294967040  ;;  %v222_v0 = vmov 0.0   ;;  %vm223_vm0 = vmmov 0   ;;  %v150_v1 = vld [vmem:[#allocation5 + $0x8] sm:$0xff]   ;;  %v151_v2 = vld [vmem:[#allocation5] sm:$0xff]  }
  0x1b   :  { %135 = vmatprep.subr.bf16.mxu0 %v222_v0  ;;  %139 = vmatprep.mubr.msk.bf16.mxu0 %vm223_vm0, %v222_v0  ;;  %v42_v3 = vld [vmem:[#allocation2] sm:$0xff]  ;;  %vm67_vm1 = vcmask 261120   ;;  %s224_s1 = smov [#allocation7]  }
  0x1c   :  { %136 = vmatpush3.bf16.msra.mxu0 %v150_v1  ;;  %v43_v4 = vpack.c.bf16 %v42_v3, %v42_v3  ;;  %v128_v5 = vld [vmem:[%s259_s2] ss:$0 sm:$0xff]  ;;  %s118_s25 = sshll.u32 %s224_s1, 4  ;;  %s119_s25 = int_to_ptr.vmem [resolvable:$true] %s118_s25 }
  0x1d   :  { %137 = vmatprep.subr.bf16.mxu0 %v222_v0  ;;  %s192_s26 = scalar_lea.vmem %s119_s25, 128  ;;  %p197_p11 = scmp.lt.s32.totalorder %s119_s25, %s119_s25 }
  0x1e   :  { %p193_p10 = scmp.ne.s32.totalorder %s119_s25, %s192_s26  ;;  %p198_p12 = scmp.lt.s32.totalorder %s192_s26, %s192_s26 }
  0x20   :  { %138 = vmatpush3.bf16.msra.mxu0 %v151_v2  ;;  %p199_p13 = por %p198_p12, %p197_p11 }
  0x22   :  { %p200_p0 = pnand %p199_p13, %p193_p10 }
  0x23   :  { %140 = vmatmul.mubr.msk.bf16.vlgmr.msra.gmra.mxu0 %vm67_vm1, %v43_v4 }
  0xe3   :  { %v105_v6 = vpop.f32.mrf.mxu0 }
  0xe4   :  { %v106_v7 = vadd.f32 %v128_v5, %v105_v6 }
  0xe5   :  { %v141_v8 = vpop.f32.mrf.mxu0 }
  0xe6   :  { %111 = vst [vmem:[#allocation7] sm:$0xff] %v106_v7 }
  0xe7   :  { %v108_v9 = vpop.f32.mrf.mxu0 }
  0xe8   :  { %203 = shalt.err (!%p200_p0)
}
  0xe9   :  { %121 = dma.vmem_to_hbm [thread:$0]  %s119_s25, 128, %s260_s3, [#allocation4]   ;;  %v142_v10 = vpop.f32.mrf.mxu0 }
  0xea   :  { %216 = dma.done.wait [#allocation4], 128  }
  0xeb   :  { %217 = vsyncadd [#allocation4], 4294967168 }
  0xec   :  { %125 = vsyncpa [#allocation3], 1 }
  0xed   :  { %126 = vsyncpa [#allocation6], 1 }
  0xee   :  { %127 = vsyncpa [#allocation4], 1 }

// kernel: tpu_custom_call.1
= control target key start
LH: loop header
LB: loop body
LE: loop exit
PB: predicated region body
PF: predicated region fallthrough
CT: control target
= control target key end

     0   :  { %8 = vsyncpa [#allocation3], 0  ;;  %s257_s0 = inlined_call_operand.hbm [shape: f32[8,32], index: 0, kind: input, shape index: {}]   ;;  %s258_s1 = inlined_call_operand.hbm [shape: bf16[32,128], index: 1, kind: input, shape index: {}]   ;;  %s259_s2 = inlined_call_operand.vmem [shape: f32[1,128], index: 2, kind: input, shape index: {}]   ;;  %s260_s3 = inlined_call_operand.hbm [shape: f32[8,128], index: 3, kind: output, shape index: {}]  }
   0x1   :  { %9 = vsyncpa [#allocation6], 0 }
   0x2   :  { %10 = vsyncpa [#allocation4], 0  ;;  %s218_s12 = smov [#allocation2]   ;;  %s219_s14 = smov [#allocation5]  }
   0x3   :  { %s17_s13 = sshll.u32 %s218_s12, 4  ;;  %s26_s15 = sshll.u32 %s219_s14, 4  ;;  %s18_s13 = int_to_ptr.vmem [resolvable:$true] %s17_s13  ;;  %s27_s15 = int_to_ptr.vmem [resolvable:$true] %s26_s15 }
   0x4   :  { %s160_s16 = scalar_lea.vmem %s18_s13, 128  ;;  %p165_p1 = scmp.lt.s32.totalorder %s18_s13, %s18_s13 }
   0x5   :  { %p161_p0 = scmp.ne.s32.totalorder %s18_s13, %s160_s16  ;;  %p166_p2 = scmp.lt.s32.totalorder %s160_s16, %s160_s16 }
   0x7   :  { %p167_p3 = por %p166_p2, %p165_p1 }
   0x9   :  { %p168_p4 = pnand %p167_p3, %p161_p0 }
   0xb   :  { %171 = shalt.err (!%p168_p4)
}
   0xc   :  { %20 = dma.hbm_to_vmem [thread:$0]  %s257_s0, 128, %s18_s13, [#allocation3]  }
   0xd   :  { %s180_s19 = scalar_lea.vmem %s27_s15, 256  ;;  %p185_p6 = scmp.lt.s32.totalorder %s27_s15, %s27_s15 }
   0xe   :  { %p181_p5 = scmp.ne.s32.totalorder %s27_s15, %s180_s19  ;;  %p186_p7 = scmp.lt.s32.totalorder %s180_s19, %s180_s19 }
  0x10   :  { %p187_p8 = por %p186_p7, %p185_p6 }
  0x12   :  { %p188_p9 = pnand %p187_p8, %p181_p5 }
  0x14   :  { %191 = shalt.err (!%p188_p9)
}
  0x15   :  { %s220_s20 = smov 64   ;;  %s221_s21 = smov 4  }
  0x16   :  { %32 = dma.hbm_to_vmem [thread:$0]  %s258_s1, 256, %s27_s15, [#allocation6], %s220_s20, %s220_s20, %s221_s21  }
  0x17   :  { %212 = dma.done.wait [#allocation3], 128  }
  0x18   :  { %213 = vsyncadd [#allocation3], 4294967168 }
  0x19   :  { %214 = dma.done.wait [#allocation6], 256  }
  0x1a   :  { %215 = vsyncadd [#allocation6], 4294967040  ;;  %v222_v0 = vmov 0.0   ;;  %vm223_vm0 = vmmov 0   ;;  %v150_v1 = vld [vmem:[#allocation5 + $0x8] sm:$0xff]   ;;  %v151_v2 = vld [vmem:[#allocation5] sm:$0xff]  }
  0x1b   :  { %135 = vmatprep.subr.bf16.mxu0 %v222_v0  ;;  %139 = vmatprep.mubr.msk.bf16.mxu0 %vm223_vm0, %v222_v0  ;;  %v42_v3 = vld [vmem:[#allocation2] sm:$0xff]  ;;  %vm67_vm1 = vcmask 261120   ;;  %s224_s1 = smov [#allocation7]  }
  0x1c   :  { %136 = vmatpush3.bf16.msra.mxu0 %v150_v1  ;;  %v43_v4 = vpack.c.bf16 %v42_v3, %v42_v3  ;;  %v128_v5 = vld [vmem:[%s259_s2] ss:$0 sm:$0xff]  ;;  %s118_s25 = sshll.u32 %s224_s1, 4  ;;  %s119_s25 = int_to_ptr.vmem [resolvable:$true] %s118_s25 }
  0x1d   :  { %137 = vmatprep.subr.bf16.mxu0 %v222_v0  ;;  %s192_s26 = scalar_lea.vmem %s119_s25, 128  ;;  %p197_p11 = scmp.lt.s32.totalorder %s119_s25, %s119_s25 }
  0x1e   :  { %p193_p10 = scmp.ne.s32.totalorder %s119_s25, %s192_s26  ;;  %p198_p12 = scmp.lt.s32.totalorder %s192_s26, %s192_s26 }
  0x20   :  { %138 = vmatpush3.bf16.msra.mxu0 %v151_v2  ;;  %p199_p13 = por %p198_p12, %p197_p11 }
  0x22   :  { %p200_p0 = pnand %p199_p13, %p193_p10 }
  0x23   :  { %140 = vmatmul.mubr.msk.bf16.vlgmr.msra.gmra.mxu0 %vm67_vm1, %v43_v4 }
  0xe3   :  { %v105_v6 = vpop.f32.mrf.mxu0 }
  0xe4   :  { %v106_v7 = vadd.f32 %v128_v5, %v105_v6 }
  0xe5   :  { %v141_v8 = vpop.f32.mrf.mxu0 }
  0xe6   :  { %111 = vst [vmem:[#allocation7] sm:$0xff] %v106_v7 }
  0xe7   :  { %v108_v9 = vpop.f32.mrf.mxu0 }
  0xe8   :  { %203 = shalt.err (!%p200_p0)
}
  0xe9   :  { %121 = dma.vmem_to_hbm [thread:$0]  %s119_s25, 128, %s260_s3, [#allocation4]   ;;  %v142_v10 = vpop.f32.mrf.mxu0 }
  0xea   :  { %216 = dma.done.wait [#allocation4], 128  }
  0xeb   :  { %217 = vsyncadd [#allocation4], 4294967168 }
  0xec   :  { %125 = vsyncpa [#allocation3], 1 }
  0xed   :  { %126 = vsyncpa [#allocation6], 1 }
  0xee   :  { %127 = vsyncpa [#allocation4], 1 }

</bundles_post_ra>
